<compile_context>
chip_gen: v7x
topology: tpu7x:2x2x1
jax: 0.10.0
libtpu: 0.0.40
codegen_flags: <defaults>
</compile_context>

<pallas_src>
import math
import jax
import jax.numpy as jnp
from jax.experimental import pallas as pl
from jax.experimental.pallas import tpu as pltpu


def _round_up(x, m):
    return ((x + m - 1) // m) * m


# ---------------------------------------------------------------------------
# Kernel 1: fused im2col-matmul + bias + ReLU  (stand-in for `features`).
#   x_ref: (TM, K_pad)   bf16  im2col rows (one row per output pixel)
#   w_ref: (K_pad, C_pad) bf16 packed 3x3 conv weights
#   b_ref: (1, C_pad)     f32  bias
#   o_ref: (TM, C_pad)    bf16 output rows (lane-dense, C_pad % 128 == 0)
# ---------------------------------------------------------------------------
def _conv_mm_bias_relu_kernel(x_ref, w_ref, b_ref, o_ref):
    acc = jnp.dot(x_ref[...], w_ref[...], preferred_element_type=jnp.float32)
    acc = acc + b_ref[...]                      # f32 epilogue (v5e-safe)
    o_ref[...] = jnp.maximum(acc, 0.0).astype(o_ref.dtype)


def _im2col_3x3_same(x_nhwc):
    """3x3 'same' conv im2col (wrapper-side XLA glue, done once in bf16)."""
    B, H, W, C = x_nhwc.shape
    xp = jnp.pad(x_nhwc, ((0, 0), (1, 1), (1, 1), (0, 0)))
    taps = [xp[:, dy:dy + H, dx:dx + W, :] for dy in range(3) for dx in range(3)]
    return jnp.concatenate(taps, axis=-1)       # (B, H, W, 9*C)


def conv3x3_bias_relu(x_nhwc_bf16, w_packed, b_packed):
    """Returns feature map as (B, H*W, C_pad) bf16."""
    B, H, W, Cin = x_nhwc_bf16.shape
    K_pad, C_pad = w_packed.shape
    k_real = 9 * Cin

    cols = _im2col_3x3_same(x_nhwc_bf16)                      # (B, H, W, 9*Cin)
    M = B * H * W
    cols = cols.reshape(M, k_real)
    if k_real < K_pad:
        cols = jnp.pad(cols, ((0, 0), (0, K_pad - k_real)))   # lane-dense K

    # >= 2 parallel row-blocks when possible (keeps both v7x TCs busy),
    # otherwise a single block to amortize per-step pipeline overhead.
    tm = 256 if (M % 256 == 0 and M // 256 >= 2) else M

    out = pl.pallas_call(
        _conv_mm_bias_relu_kernel,
        out_shape=jax.ShapeDtypeStruct((M, C_pad), jnp.bfloat16),
        grid=(M // tm,),
        in_specs=[
            pl.BlockSpec((tm, K_pad), lambda i: (i, 0)),
            pl.BlockSpec((K_pad, C_pad), lambda i: (0, 0)),
            pl.BlockSpec((1, C_pad), lambda i: (0, 0)),
        ],
        out_specs=pl.BlockSpec((tm, C_pad), lambda i: (i, 0)),
        compiler_params=pltpu.CompilerParams(
            dimension_semantics=("parallel",),
            vmem_limit_bytes=32 * 1024 * 1024),
    )(cols, w_packed, b_packed)
    return out.reshape(B, H * W, C_pad)


# ---------------------------------------------------------------------------
# Kernel 2: HashNet head, fused per batch element:
#   global average pool (ones-row MXU matmul) -> Linear -> tanh(scale * y)
#   scale_ref: (1, 1)        f32  SMEM scalar
#   feat_ref : (1, S, C_pad) bf16 one batch element's feature rows
#   w_ref    : (C_pad, K_pad) f32 padded hash weight (PyTorch weight.T)
#   b_ref    : (1, K_pad)     f32 padded hash bias
#   o_ref    : (1, 1, K_pad)  f32 lane-dense output
# ---------------------------------------------------------------------------
def _hash_head_kernel(scale_ref, feat_ref, w_ref, b_ref, o_ref):
    S = feat_ref.shape[1]
    feat = feat_ref[0]                                        # (S, C) bf16
    ones = jnp.full((1, S), 1.0 / S, dtype=feat.dtype)        # mean as matmul
    pooled = jnp.dot(ones, feat, preferred_element_type=jnp.float32)   # (1, C)
    y = jnp.dot(pooled, w_ref[...], preferred_element_type=jnp.float32)
    y = y + b_ref[...]
    o_ref[...] = jnp.tanh(scale_ref[0, 0] * y).reshape(o_ref.shape)


def hash_head(feat_bsc, w_packed, b_packed, scale):
    B, S, C_pad = feat_bsc.shape
    K_pad = w_packed.shape[1]
    scale_arr = jnp.full((1, 1), scale, jnp.float32)
    out = pl.pallas_call(
        _hash_head_kernel,
        out_shape=jax.ShapeDtypeStruct((B, 1, K_pad), jnp.float32),
        grid=(B,),
        in_specs=[
            pl.BlockSpec(memory_space=pltpu.SMEM),
            pl.BlockSpec((1, S, C_pad), lambda b: (b, 0, 0)),
            pl.BlockSpec((C_pad, K_pad), lambda b: (0, 0)),
            pl.BlockSpec((1, K_pad), lambda b: (0, 0)),
        ],
        out_specs=pl.BlockSpec((1, 1, K_pad), lambda b: (b, 0, 0)),
        compiler_params=pltpu.CompilerParams(
            dimension_semantics=("parallel",)),
    )(scale_arr, feat_bsc, w_packed, b_packed)
    return out[:, 0, :]


# ---------------------------------------------------------------------------
# Module wrapper (parameter packing + iter_num/scale bookkeeping = glue).
# ---------------------------------------------------------------------------
class InceptionV4:
    def __init__(self, hash_bit, in_channels=4, feat_channels=32, key=None):
        if key is None:
            key = jax.random.PRNGKey(0)
        k1, k2 = jax.random.split(key)

        self.in_channels = in_channels
        self.feat_channels = feat_channels
        self.hash_bit = hash_bit

        # Padded (lane-dense) dimensions.
        self.k_pad = max(128, _round_up(9 * in_channels, 128))     # conv contraction
        self.c_pad = max(128, _round_up(feat_channels, 128))       # conv out channels
        self.kh_pad = max(128, _round_up(hash_bit, 128))           # hash out dim

        # Stand-in feature extractor params (deterministic synthetic init),
        # packed into a zero-padded (K_pad, C_pad) bf16 matmul weight.
        conv_w = jax.random.normal(
            k1, (3, 3, in_channels, feat_channels), jnp.float32) * 0.05
        w9 = conv_w.reshape(9 * in_channels, feat_channels)
        self.conv_w_packed = (
            jnp.zeros((self.k_pad, self.c_pad), jnp.float32)
            .at[:9 * in_channels, :feat_channels].set(w9)
            .astype(jnp.bfloat16))
        self.conv_b_packed = jnp.zeros((1, self.c_pad), jnp.float32)

        # hash_layer: weight ~ N(0, 0.01), bias = 0 (as in the PyTorch module).
        # PyTorch stores (hash_bit, in_features); we keep the transpose
        # (in_features, hash_bit), zero-padded so padded channels contribute 0.
        hash_w = jax.random.normal(
            k2, (feat_channels, hash_bit), jnp.float32) * 0.01
        self.hash_w_packed = (
            jnp.zeros((self.c_pad, self.kh_pad), jnp.float32)
            .at[:feat_channels, :hash_bit].set(hash_w))
        self.hash_b_packed = jnp.zeros((1, self.kh_pad), jnp.float32)

        # Scale schedule state (same semantics as the PyTorch module).
        self.iter_num = 0
        self.step_size = 200
        self.gamma = 0.005
        self.power = 0.5
        self.init_scale = 1.0
        self.scale = self.init_scale
        self._in_features = hash_bit

    def forward(self, x_nchw, training=False):
        if training:
            self.iter_num += 1
        # NCHW (PyTorch) -> NHWC, bf16 matmul operands.
        x = jnp.transpose(x_nchw, (0, 2, 3, 1)).astype(jnp.bfloat16)
        feat = conv3x3_bias_relu(x, self.conv_w_packed, self.conv_b_packed)
        # Scale update (same placement as PyTorch: not gated on training).
        if self.iter_num % self.step_size == 0:
            self.scale = self.init_scale * math.pow(
                1.0 + self.gamma * self.iter_num, self.power)
        # avg_pool + view + hash_layer + tanh(scale * y), fused in one kernel.
        y = hash_head(feat, self.hash_w_packed, self.hash_b_packed, self.scale)
        return y[:, :self.hash_bit]

    def output_num(self):
        return self._in_features


if __name__ == "__main__":
    key = jax.random.PRNGKey(0)
    kx, kp = jax.random.split(key)
    B, C, H, W = 2, 4, 16, 16
    hash_bit = 8
    x = jax.random.normal(kx, (B, C, H, W), jnp.float32)

    model = InceptionV4(hash_bit=hash_bit, in_channels=C, feat_channels=32,
                        key=kp)
    y = model.forward(x)
    y = jax.block_until_ready(y)
    assert y.shape == (B, hash_bit)
    assert bool(jnp.all(jnp.isfinite(y)))
    assert bool(jnp.all(jnp.abs(y) <= 1.0))  # tanh range
    print("KERNEL_OK")
</pallas_src>

<mosaic_0001>
module attributes {stable_mosaic.version = 11 : i64} {
  func.func @_conv_mm_bias_relu_kernel(%arg0: i32, %arg1: memref<256x128xbf16, #tpu.memory_space<vmem>>, %arg2: memref<128x128xbf16, #tpu.memory_space<vmem>>, %arg3: memref<1x128xf32, #tpu.memory_space<vmem>>, %arg4: memref<256x128xbf16, #tpu.memory_space<vmem>>) attributes {dimension_semantics = [#tpu.dimension_semantics<parallel>], iteration_bounds = array<i64: 2>, scalar_prefetch = 0 : i64, scratch_operands = 0 : i64, tpu.core_type = #tpu.core_type<tc>, window_params = [{transform_indices = @transform_0, window_bounds = array<i64: 256, 128>}, {pipeline_mode = #tpu.pipeline_mode<synchronous>, transform_indices = @transform_1, window_bounds = array<i64: 128, 128>}, {pipeline_mode = #tpu.pipeline_mode<synchronous>, transform_indices = @transform_2, window_bounds = array<i64: 1, 128>}, {transform_indices = @transform_3, window_bounds = array<i64: 256, 128>}]} {
    %c0 = arith.constant 0 : index
    %c0_0 = arith.constant 0 : index
    %0 = vector.load %arg1[%c0, %c0_0] : memref<256x128xbf16, #tpu.memory_space<vmem>>, vector<256x128xbf16>
    %c0_1 = arith.constant 0 : index
    %c0_2 = arith.constant 0 : index
    %1 = vector.load %arg2[%c0_1, %c0_2] : memref<128x128xbf16, #tpu.memory_space<vmem>>, vector<128x128xbf16>
    %cst = arith.constant dense<0.000000e+00> : vector<256x128xf32>
    %2 = tpu.matmul %0, %1, %cst {dimension_numbers = #tpu.dot_dimension_numbers<[1], [0], [0], [1], [0, 0, 1, 1], [], []>} : vector<256x128xbf16>, vector<128x128xbf16>, vector<256x128xf32> -> vector<256x128xf32>
    %c0_3 = arith.constant 0 : index
    %c0_4 = arith.constant 0 : index
    %3 = vector.load %arg3[%c0_3, %c0_4] : memref<1x128xf32, #tpu.memory_space<vmem>>, vector<1x128xf32>
    %4 = vector.broadcast %3 : vector<1x128xf32> to vector<256x128xf32>
    %5 = arith.addf %2, %4 : vector<256x128xf32>
    %cst_5 = arith.constant 0.000000e+00 : f32
    %6 = vector.broadcast %cst_5 : f32 to vector<256x128xf32>
    %7 = arith.maximumf %5, %6 : vector<256x128xf32>
    %8 = arith.truncf %7 : vector<256x128xf32> to vector<256x128xbf16>
    %c0_6 = arith.constant 0 : index
    %c0_7 = arith.constant 0 : index
    %9 = vector.load %arg4[%c0_6, %c0_7] : memref<256x128xbf16, #tpu.memory_space<vmem>>, vector<256x128xbf16>
    tpu.vector_store %arg4[%c0_6, %c0_7], %8 {strides = array<i32>} : memref<256x128xbf16, #tpu.memory_space<vmem>>, vector<256x128xbf16>,
    return
  }
  func.func @transform_0(%arg0: i32) -> (i32, i32) {
    %c0_i32 = arith.constant 0 : i32
    %c0_i32_0 = arith.constant 0 : i32
    return %arg0, %c0_i32 : i32, i32
  }
  func.func @transform_1(%arg0: i32) -> (i32, i32) {
    %c0_i32 = arith.constant 0 : i32
    %c0_i32_0 = arith.constant 0 : i32
    %c0_i32_1 = arith.constant 0 : i32
    return %c0_i32, %c0_i32_0 : i32, i32
  }
  func.func @transform_2(%arg0: i32) -> (i32, i32) {
    %c0_i32 = arith.constant 0 : i32
    %c0_i32_0 = arith.constant 0 : i32
    %c0_i32_1 = arith.constant 0 : i32
    return %c0_i32, %c0_i32_0 : i32, i32
  }
  func.func @transform_3(%arg0: i32) -> (i32, i32) {
    %c0_i32 = arith.constant 0 : i32
    %c0_i32_0 = arith.constant 0 : i32
    return %arg0, %c0_i32 : i32, i32
  }
}

</mosaic_0001>

<bundles_post_ra>
// kernel: tpu_custom_call.1
= control target key start
LH: loop header
LB: loop body
LE: loop exit
PB: predicated region body
PF: predicated region fallthrough
CT: control target
= control target key end

     0   :  { %8 = vsyncpa [#allocation3], 0  ;;  %s1673_s0 = inlined_call_operand.hbm [shape: bf16[512,128], index: 0, kind: input, shape index: {}]   ;;  %s1674_s1 = inlined_call_operand.hbm [shape: bf16[128,128], index: 1, kind: input, shape index: {}]   ;;  %s1675_s2 = inlined_call_operand.vmem [shape: f32[1,128], index: 2, kind: input, shape index: {}]   ;;  %s1676_s3 = inlined_call_operand.hbm [shape: bf16[512,128], index: 3, kind: output, shape index: {}]  }
   0x1   :  { %10 = vsyncpa [#allocation3 + $0x1], 0 }
   0x2   :  { %11 = vsyncpa [#allocation6], 0 }
   0x3   :  { %12 = vsyncpa [#allocation4], 0 }
   0x4   :  { %14 = vsyncpa [#allocation4 + $0x1], 0  ;;  %s1388_s12 = smov 0   ;;  %s1390_s13 = smov 0  }
   0x5   :  { %s1392_s14 = smov 0   ;;  %s1394_s15 = smov 0  }
   0x6 LB: > { %s1409_s16 = sadd.s32 4294967295, %s1359_s15   ;;  %s856_s17 = sadd.s32 4294967294, %s1359_s15   ;;  %s1359_s15 = sphi %s1394_s15, %s1696_s15   ;;  %s1355_s14 = sphi %s1392_s14, %s1695_s14   ;;  %s1351_s13 = sphi %s1390_s13, %s1694_s13   ;;  %s1347_s12 = sphi %s1388_s12, %s1693_s12  }
   0x7   : > { %p40_p0 = scmp.ne.s32.totalorder %s1351_s13, %s1347_s12  ;;  %p1677_p1 = scmp.eq.s32.totalorder %s1409_s16, 0 }
   0x8   : > { %p112_p3 = scmp.eq.s32.totalorder %s856_s17, 1  ;;  %p857_p5 = scmp.ge.s32.totalorder %s1359_s15, 1 }
   0x9   : > { %p1418_p4 = por %p1677_p1, %p40_p0  ;;  %p119_p7 = scmp.lt.s32.totalorder %s1359_s15, 3 }
   0xa   : > { %p1423_p6 = por %p112_p3, %p40_p0  ;;  %s1361_s21 = smov [#allocation5]  }
   0xb   : > { %s1680_s18 = scalar_select %p1418_p4, 1, 0 }
   0xc   : > { %s1681_s19 = scalar_select %p1423_p6, 1, 0 }
   0xd   : > { %p1428_p8 = pnand %p857_p5, %p119_p7  ;;  %s131_s22 = sshll.u32 %s1361_s21, 4  ;;  %s1432_s22 = int_to_ptr.vmem [resolvable:$true] %s131_s22 }
   0xe   : > { %s1444_s24 = sadd.s32 1, %s1359_s15   ;;  %s27_s25 = sadd.s32 1, %s1355_s14 }
   0xf   : > { %s1682_s20 = scalar_select %p1428_p8, 1, 0 }
  0x10   : > { %p1154_p9 = pneg %p1428_p8  ;;  %s24_s26 = ssub.s32 %s1359_s15, %s1444_s24 }
  0x11   : > { %s1231_s29 = scalar_lea.hbm %s1674_s1, 1024 }
  0x12   : > { %p1439_p11 = pnand %p1154_p9, %p1677_p1  ;;  %p1232_p12 = scmp.ne.s32.totalorder %s1674_s1, %s1231_s29 }
  0x13   : > { %p1238_p5 = scmp.lt.u32.totalorder %s1231_s29, %s1674_s1 }
  0x14   : > { %p1233_p13 = pneg %p1439_p11 }
  0x16   : > { %p1234_p0 = pnand %p1233_p13, %p1232_p12 }
  0x18   : > { %p1235_p3 = pneg %p1234_p0 }
  0x1a   : > { %p1240_p7 = pnand %p1238_p5, %p1235_p3 }
  0x1c   : > { %1243 = shalt.err (!%p1240_p7)
}
  0x1d   : > { %s1244_s7 = scalar_lea.vmem %s1432_s22, 1024  ;;  %p1252_p2 = scmp.lt.s32.totalorder %s1432_s22, %s1432_s22 }
  0x1e   : > { %p1245_p9 = scmp.ne.s32.totalorder %s1432_s22, %s1244_s7  ;;  %p1253_p6 = scmp.lt.s32.totalorder %s1244_s7, %s1244_s7 }
  0x20   : > { %p1247_p10 = pnand %p1245_p9, %p1233_p13  ;;  %p1254_p4 = por %p1253_p6, %p1252_p2 }
  0x22   : > { %p1248_p1 = pneg %p1247_p10 }
  0x24   : > { %p1255_p8 = pnand %p1254_p4, %p1248_p1 }
  0x26   : > { %1258 = shalt.err (!%p1255_p8)
}
  0x27   : > { %s1362_s8 = smov 64   ;;  %s1363_s9 = smov 4  }
  0x28   : > { %1157 = dma.hbm_to_vmem [thread:$0]  (!%p1439_p11), %s1674_s1, 1024, %s1432_s22, [#allocation6], %s1362_s8, %s1362_s8, %s1363_s9  }
  0x29   : > { %p25_p1 = scmp.eq.s32.totalorder %s24_s26, 0  ;;  %p34_p2 = scmp.ne.s32.totalorder %s1355_s14, %s1351_s13 }
  0x2a   : > { %p35_p4 = scmp.eq.s32.totalorder %s1359_s15, 0  ;;  %p1167_p6 = scmp.lt.s32.totalorder %s1359_s15, 2 }
  0x2b   : > { %s1478_s17 = scalar_select %p25_p1, %s1355_s14, %s27_s25  }
  0x2c   : > { %p36_p8 = por %p35_p4, %p34_p2  ;;  %p1684_p10 = scmp.eq.s32.totalorder %s1409_s16, 1 }
  0x2d   : > { %s148_s23 = sand.u32 1, %s1355_s14   ;;  %s929_s27 = sshll.u32 %s1359_s15, 11 }
  0x2e   : > { %p1482_p12 = por %p1684_p10, %p34_p2  ;;  %s860_s28 = sshll.u32 %s148_s23, 7 }
  0x2f   : > { %s1491_s4 = scalar_lea.hbm %s1673_s0, %s929_s27  ;;  %s152_s22 = scalar_lea.vmem [#allocation2], %s860_s28 }
  0x30   : > { %s159_s25 = sshll.u32 %s152_s22, 4  ;;  %p1493_p11 = pnand %p1167_p6, %p36_p8  ;;  %s1497_s25 = int_to_ptr.vmem [resolvable:$true] %s159_s25 }
  0x31   : > { %s1499_s5 = scalar_lea.sflag [#allocation3], %s148_s23  ;;  %s1259_s6 = scalar_lea.hbm %s1491_s4, 2048 }
  0x32   : > { %p1260_p13 = scmp.ne.s32.totalorder %s1491_s4, %s1259_s6  ;;  %p1261_p0 = pneg %p1493_p11 }
  0x33   : > { %s1264_s11 = scalar_lea.hbm %s1673_s0, 4096  ;;  %p1265_p7 = scmp.lt.u32.totalorder %s1491_s4, %s1673_s0 }
  0x34   : > { %p1262_p3 = pnand %p1261_p0, %p1260_p13  ;;  %p1266_p9 = scmp.lt.u32.totalorder %s1264_s11, %s1259_s6 }
  0x35   : > { %p1268_p2 = scmp.lt.u32.totalorder %s1259_s6, %s1491_s4 }
  0x36   : > { %p1263_p5 = pneg %p1262_p3  ;;  %p1267_p1 = por %p1266_p9, %p1265_p7 }
  0x38   : > { %p1269_p4 = por %p1268_p2, %p1267_p1 }
  0x3a   : > { %p1270_p6 = pnand %p1269_p4, %p1263_p5 }
  0x3c   : > { %1273 = shalt.err (!%p1270_p6)
}
  0x3d   : > { %s1274_s23 = scalar_lea.vmem %s1497_s25, 2048  ;;  %s1364_s29 = smov [#allocation2]  }
  0x3e   : > { %p1275_p8 = scmp.ne.s32.totalorder %s1497_s25, %s1274_s23  ;;  %s1279_s30 = sshll.u32 %s1364_s29, 4  ;;  %s1280_s30 = int_to_ptr.vmem [resolvable:$false] %s1279_s30 }
  0x3f   : > { %s1281_s22 = scalar_lea.vmem %s1280_s30, 4096  ;;  %p1282_p3 = scmp.lt.s32.totalorder %s1497_s25, %s1280_s30 }
  0x40   : > { %p1277_p10 = pnand %p1275_p8, %p1261_p0  ;;  %p1283_p7 = scmp.lt.s32.totalorder %s1281_s22, %s1274_s23 }
  0x42   : > { %p1278_p13 = pneg %p1277_p10  ;;  %p1284_p9 = por %p1283_p7, %p1282_p3 }
  0x44   : > { %p1285_p1 = pnand %p1284_p9, %p1278_p13 }
  0x46   : > { %1288 = shalt.err (!%p1285_p1)
}
  0x47   : > { %1161 = dma.hbm_to_vmem [thread:$0]  (!%p1493_p11), %s1491_s4, 2048, %s1497_s25, %s1499_s5, %s1362_s8, %s1362_s8, %s1363_s9  }
  0x48   : > { %p1687_p0 = scmp.ne.s32.totalorder %s1682_s20, 0 }
  0x49   : > { %s1533_s6 = sand.u32 (!%p1687_p0), 1, %s1351_s13   ;;  %p1688_p5 = scmp.ne.s32.totalorder (!%p1687_p0), %s1680_s18, 0 }
  0x4a   : > { %171 = sbr.rel (%p1687_p0) target bundleno = 378 (0x17a), region = 32  ;;  %s864_s7 = sshll.u32 (!%p1687_p0), %s1533_s6, 7 }
  0x4b   : > { %s174_s10 = scalar_lea.sflag (!%p1687_p0), [#allocation3], %s1533_s6  ;;  %s1539_s26 = scalar_lea.vmem (!%p1687_p0), [#allocation2], %s864_s7 }
  0x51   : > { %1334 = dma.done.wait (%p1688_p5), %s174_s10, 2048  }
  0x52   : > { %1336 = vsyncadd (%p1688_p5), %s174_s10, 4294965248  ;;  %p1689_p11 = scmp.eq.s32.totalorder %s1409_s16, 0 }
  0x54   : > { %1338 = dma.done.wait (%p1689_p11), [#allocation6], 1024   ;;  %p1690_p2 = pmov %p1689_p11 }
  0x55   : > { %v1207_v0 = vld [vmem:[#allocation5] sm:$0xff]   ;;  %v1208_v1 = vld [vmem:[#allocation5 + $0x8] sm:$0xff]   ;;  %v1209_v2 = vld [vmem:[#allocation5 + $0x10] sm:$0xff]   ;;  %s1580_s8 = scalar_lea.vmem [#allocation7], %s864_s7  ;;  %s962_s9 = sshll.u32 %s1409_s16, 11 }
  0x56   : > { %1340 = vsyncadd (%p1690_p2), [#allocation6], 4294966272  ;;  %1082 = vmatprep.subr.bf16.mxu0 %v1207_v0  ;;  %1130 = vmatprep.subr.bf16.mxu1 %v1207_v0  ;;  %v1210_v3 = vld [vmem:[#allocation5 + $0x18] sm:$0xff]   ;;  %v1215_v4 = vld [vmem:[%s1539_s26] sm:$0xff]   ;;  %s773_s4 = sshll.u32 %s1580_s8, 4  ;;  %s1623_s16 = scalar_lea.hbm %s1676_s3, %s962_s9  ;;  %s1625_s4 = int_to_ptr.vmem [resolvable:$true] %s773_s4 }
  0x57   : > { %1083 = vmatpush3.bf16.msra.mxu0 %v1207_v0  ;;  %1138 = vmatpush3.bf16.msra.mxu1 %v1207_v0  ;;  %v1216_v5 = vld [vmem:[%s1539_s26 + $0x40] sm:$0xff]   ;;  %v1212_v7 = vld [vmem:[#allocation5 + $0x28] sm:$0xff]   ;;  %v1213_v8 = vld [vmem:[#allocation5 + $0x30] sm:$0xff]   ;;  %s760_s11 = scalar_lea.sflag [#allocation4], %s1533_s6  ;;  %s1289_s27 = scalar_lea.vmem %s1625_s4, 2048 }
  0x58   : > { %1084 = vmatprep.subr.bf16.mxu0 %v1208_v1  ;;  %1131 = vmatprep.subr.bf16.mxu1 %v1208_v1  ;;  %v1211_v6 = vld [vmem:[#allocation5 + $0x20] sm:$0xff]   ;;  %v1214_v9 = vld [vmem:[#allocation5 + $0x38] sm:$0xff]   ;;  %v1217_v10 = vld [vmem:[%s1539_s26 + $0x8] sm:$0xff]   ;;  %p1290_p4 = scmp.ne.s32.totalorder %s1625_s4, %s1289_s27  ;;  %s1365_s28 = smov [#allocation7]  }
  0x59   : > { %1098 = vmatprep.mubr.bf16.mxu0 %v1215_v4  ;;  %1114 = vmatprep.mubr.bf16.mxu1 %v1216_v5  ;;  %v1218_v11 = vld [vmem:[%s1539_s26 + $0x48] sm:$0xff]   ;;  %v1219_v12 = vld [vmem:[%s1539_s26 + $0x10] sm:$0xff]   ;;  %v1221_v14 = vld [vmem:[%s1539_s26 + $0x18] sm:$0xff]   ;;  %s1293_s23 = sshll.u32 %s1365_s28, 4  ;;  %s1294_s23 = int_to_ptr.vmem [resolvable:$false] %s1293_s23 }
  0x5a   : > { %v1220_v13 = vld [vmem:[%s1539_s26 + $0x50] sm:$0xff]   ;;  %v1222_v15 = vld [vmem:[%s1539_s26 + $0x58] sm:$0xff]   ;;  %v1223_v16 = vld [vmem:[%s1539_s26 + $0x20] sm:$0xff]   ;;  %p1291_p6 = pnand %p1290_p4, %p1482_p12  ;;  %s1295_s29 = scalar_lea.vmem %s1294_s23, 4096 }
  0x5b   : > { %1085 = vmatpush3.bf16.msra.mxu0 %v1208_v1  ;;  %1139 = vmatpush3.bf16.msra.mxu1 %v1208_v1  ;;  %v1224_v17 = vld [vmem:[%s1539_s26 + $0x60] sm:$0xff]   ;;  %v1225_v18 = vld [vmem:[%s1539_s26 + $0x28] sm:$0xff]   ;;  %v1227_v20 = vld [vmem:[%s1539_s26 + $0x30] sm:$0xff]   ;;  %p1296_p10 = scmp.lt.s32.totalorder %s1625_s4, %s1294_s23  ;;  %p1297_p13 = scmp.lt.s32.totalorder %s1295_s29, %s1289_s27 }
  0x5c   : > { %1086 = vmatprep.subr.bf16.mxu0 %v1209_v2  ;;  %1132 = vmatprep.subr.bf16.mxu1 %v1209_v2  ;;  %v1226_v19 = vld [vmem:[%s1539_s26 + $0x68] sm:$0xff]   ;;  %v1228_v21 = vld [vmem:[%s1539_s26 + $0x70] sm:$0xff]   ;;  %v1229_v22 = vld [vmem:[%s1539_s26 + $0x38] sm:$0xff]   ;;  %p1292_p8 = pneg %p1291_p6 }
  0x5d   : > { %v1230_v23 = vld [vmem:[%s1539_s26 + $0x78] sm:$0xff]   ;;  %v1568_v24 = vld [vmem:[%s1675_s2] ss:$0 sm:$0xff]  ;;  %p1298_p3 = por %p1297_p13, %p1296_p10 }
  0x5f   : > { %1087 = vmatpush3.bf16.msra.mxu0 %v1209_v2  ;;  %1140 = vmatpush3.bf16.msra.mxu1 %v1209_v2  ;;  %p1299_p7 = pnand %p1298_p3, %p1292_p8 }
  0x60   : > { %1088 = vmatprep.subr.bf16.mxu0 %v1210_v3  ;;  %1133 = vmatprep.subr.bf16.mxu1 %v1210_v3 }
  0x63   : > { %1089 = vmatpush3.bf16.msra.mxu0 %v1210_v3  ;;  %1141 = vmatpush3.bf16.msra.mxu1 %v1210_v3 }
  0x64   : > { %1090 = vmatprep.subr.bf16.mxu0 %v1211_v6  ;;  %1134 = vmatprep.subr.bf16.mxu1 %v1211_v6 }
  0x67   : > { %1091 = vmatpush3.bf16.msra.mxu0 %v1211_v6  ;;  %1142 = vmatpush3.bf16.msra.mxu1 %v1211_v6 }
  0x68   : > { %1092 = vmatprep.subr.bf16.mxu0 %v1212_v7  ;;  %1135 = vmatprep.subr.bf16.mxu1 %v1212_v7 }
  0x6b   : > { %1093 = vmatpush3.bf16.msra.mxu0 %v1212_v7  ;;  %1143 = vmatpush3.bf16.msra.mxu1 %v1212_v7 }
  0x6c   : > { %1094 = vmatprep.subr.bf16.mxu0 %v1213_v8  ;;  %1136 = vmatprep.subr.bf16.mxu1 %v1213_v8 }
  0x6f   : > { %1095 = vmatpush3.bf16.msra.mxu0 %v1213_v8  ;;  %1144 = vmatpush3.bf16.msra.mxu1 %v1213_v8 }
  0x70   : > { %1096 = vmatprep.subr.bf16.mxu0 %v1214_v9  ;;  %1137 = vmatprep.subr.bf16.mxu1 %v1214_v9 }
  0x73   : > { %1097 = vmatpush3.bf16.msra.mxu0 %v1214_v9  ;;  %1145 = vmatpush3.bf16.msra.mxu1 %v1214_v9 }
  0x76   : > { %1099 = vmatmul.mubr.bf16.vlgmr.msra.gmra.mrb[0].mxu0 %v1217_v10  ;;  %1115 = vmatmul.mubr.bf16.vlgmr.msra.gmra.mrb[0].mxu1 %v1218_v11 }
  0x77   : > { %1102 = vmatprep.mubr.bf16.mxu0 %v1219_v12  ;;  %1118 = vmatprep.mubr.bf16.mxu1 %v1220_v13 }
  0x7e   : > { %1103 = vmatmul.mubr.bf16.gmra.mrb[4].mxu0 %v1221_v14  ;;  %1119 = vmatmul.mubr.bf16.gmra.mrb[4].mxu1 %v1222_v15 }
  0x7f   : > { %1106 = vmatprep.mubr.bf16.mxu0 %v1223_v16  ;;  %1122 = vmatprep.mubr.bf16.mxu1 %v1224_v17 }
  0x86   : > { %1107 = vmatmul.mubr.bf16.gmra.mrb[8].mxu0 %v1225_v18  ;;  %1123 = vmatmul.mubr.bf16.gmra.mrb[8].mxu1 %v1226_v19 }
  0x87   : > { %1110 = vmatprep.mubr.bf16.mxu0 %v1227_v20  ;;  %1126 = vmatprep.mubr.bf16.mxu1 %v1228_v21 }
  0x8e   : > { %1111 = vmatmul.mubr.bf16.gmra.mrb[12].mxu0 %v1229_v22  ;;  %1127 = vmatmul.mubr.bf16.gmra.mrb[12].mxu1 %v1230_v23 }
 0x149   : > { %v1100_v25 = vpop.f32.mrb[0].mxu0  ;;  %v1116_v26 = vpop.f32.mrb[0].mxu1 }
 0x14a   : > { %v449_v27 = vadd.f32 %v1100_v25, %v1568_v24  ;;  %v513_v28 = vadd.f32 %v1116_v26, %v1568_v24  ;;  %v440_v29 = vpop.f32.mrb[1].mxu0  ;;  %v504_v30 = vpop.f32.mrb[1].mxu1 }
 0x14b   : > { %v441_v31 = vadd.f32 %v1568_v24, %v440_v29  ;;  %v505_v32 = vadd.f32 %v1568_v24, %v504_v30  ;;  %v1101_v33 = vpop.f32.mrb[2].mxu0  ;;  %v1117_v34 = vpop.f32.mrb[2].mxu1 }
 0x14c   : > { %v452_v35 = vadd.f32 %v1101_v33, %v1568_v24  ;;  %v516_v36 = vadd.f32 %v1117_v34, %v1568_v24  ;;  %v443_v37 = vpop.f32.mrb[3].mxu0  ;;  %v507_v38 = vpop.f32.mrb[3].mxu1  ;;  %v569_v41 = vmax.f32 %v449_v27, 0.0  ;;  %v585_v42 = vmax.f32 %v513_v28, 0.0 }
 0x14d   : > { %v444_v39 = vadd.f32 %v1568_v24, %v443_v37  ;;  %v508_v40 = vadd.f32 %v1568_v24, %v507_v38  ;;  %v567_v45 = vmax.f32 %v441_v31, 0.0  ;;  %v583_v46 = vmax.f32 %v505_v32, 0.0 }
 0x14e   : > { %v570_v43 = vmax.f32 %v452_v35, 0.0  ;;  %v586_v44 = vmax.f32 %v516_v36, 0.0 }
 0x14f   : > { %v568_v47 = vmax.f32 %v444_v39, 0.0  ;;  %v584_v48 = vmax.f32 %v508_v40, 0.0 }
 0x150   : > { %v971_v49 = vpack.c.bf16 %v570_v43, %v569_v41  ;;  %v1011_v50 = vpack.c.bf16 %v586_v44, %v585_v42 }
 0x151   : > { %v966_v51 = vpack.c.bf16 %v568_v47, %v567_v45  ;;  %v1006_v52 = vpack.c.bf16 %v584_v48, %v583_v46  ;;  %v1104_v53 = vpop.f32.mrb[4].mxu0  ;;  %v1120_v54 = vpop.f32.mrb[4].mxu1 }
 0x152   : > { %1043 = vst [vmem:[%s1580_s8 + $0x8] sm:$0xff] %v971_v49   ;;  %1051 = vst [vmem:[%s1580_s8 + $0x48] sm:$0xff] %v1011_v50   ;;  %v465_v55 = vadd.f32 %v1104_v53, %v1568_v24  ;;  %v529_v56 = vadd.f32 %v1120_v54, %v1568_v24  ;;  %v456_v57 = vpop.f32.mrb[5].mxu0  ;;  %v520_v58 = vpop.f32.mrb[5].mxu1 }
 0x153   : > { %967 = vst [vmem:[%s1580_s8] sm:$0xff] %v966_v51   ;;  %1050 = vst [vmem:[%s1580_s8 + $0x40] sm:$0xff] %v1006_v52   ;;  %v457_v59 = vadd.f32 %v1568_v24, %v456_v57  ;;  %v521_v60 = vadd.f32 %v1568_v24, %v520_v58  ;;  %v1105_v61 = vpop.f32.mrb[6].mxu0  ;;  %v1121_v62 = vpop.f32.mrb[6].mxu1 }
 0x154   : > { %v468_v63 = vadd.f32 %v1105_v61, %v1568_v24  ;;  %v532_v0 = vadd.f32 %v1121_v62, %v1568_v24  ;;  %v459_v1 = vpop.f32.mrb[7].mxu0  ;;  %v523_v2 = vpop.f32.mrb[7].mxu1  ;;  %v573_v5 = vmax.f32 %v465_v55, 0.0  ;;  %v589_v6 = vmax.f32 %v529_v56, 0.0 }
 0x155   : > { %v460_v3 = vadd.f32 %v1568_v24, %v459_v1  ;;  %v524_v4 = vadd.f32 %v1568_v24, %v523_v2  ;;  %v571_v9 = vmax.f32 %v457_v59, 0.0  ;;  %v587_v10 = vmax.f32 %v521_v60, 0.0 }
 0x156   : > { %v574_v7 = vmax.f32 %v468_v63, 0.0  ;;  %v590_v8 = vmax.f32 %v532_v0, 0.0 }
 0x157   : > { %v572_v11 = vmax.f32 %v460_v3, 0.0  ;;  %v588_v12 = vmax.f32 %v524_v4, 0.0 }
 0x158   : > { %v981_v13 = vpack.c.bf16 %v574_v7, %v573_v5  ;;  %v1021_v14 = vpack.c.bf16 %v590_v8, %v589_v6 }
 0x159   : > { %v976_v15 = vpack.c.bf16 %v572_v11, %v571_v9  ;;  %v1016_v16 = vpack.c.bf16 %v588_v12, %v587_v10  ;;  %v1108_v17 = vpop.f32.mrb[8].mxu0  ;;  %v1124_v18 = vpop.f32.mrb[8].mxu1 }
 0x15a   : > { %1045 = vst [vmem:[%s1580_s8 + $0x18] sm:$0xff] %v981_v13   ;;  %1053 = vst [vmem:[%s1580_s8 + $0x58] sm:$0xff] %v1021_v14   ;;  %v481_v19 = vadd.f32 %v1108_v17, %v1568_v24  ;;  %v545_v20 = vadd.f32 %v1124_v18, %v1568_v24  ;;  %v472_v21 = vpop.f32.mrb[9].mxu0  ;;  %v536_v22 = vpop.f32.mrb[9].mxu1 }
 0x15b   : > { %1044 = vst [vmem:[%s1580_s8 + $0x10] sm:$0xff] %v976_v15   ;;  %1052 = vst [vmem:[%s1580_s8 + $0x50] sm:$0xff] %v1016_v16   ;;  %v473_v23 = vadd.f32 %v1568_v24, %v472_v21  ;;  %v537_v25 = vadd.f32 %v1568_v24, %v536_v22  ;;  %v1109_v26 = vpop.f32.mrb[10].mxu0  ;;  %v1125_v27 = vpop.f32.mrb[10].mxu1 }
 0x15c   : > { %v484_v28 = vadd.f32 %v1109_v26, %v1568_v24  ;;  %v548_v29 = vadd.f32 %v1125_v27, %v1568_v24  ;;  %v475_v30 = vpop.f32.mrb[11].mxu0  ;;  %v539_v31 = vpop.f32.mrb[11].mxu1  ;;  %v577_v34 = vmax.f32 %v481_v19, 0.0  ;;  %v593_v35 = vmax.f32 %v545_v20, 0.0 }
 0x15d   : > { %v476_v32 = vadd.f32 %v1568_v24, %v475_v30  ;;  %v540_v33 = vadd.f32 %v1568_v24, %v539_v31  ;;  %v575_v38 = vmax.f32 %v473_v23, 0.0  ;;  %v591_v39 = vmax.f32 %v537_v25, 0.0 }
 0x15e   : > { %v578_v36 = vmax.f32 %v484_v28, 0.0  ;;  %v594_v37 = vmax.f32 %v548_v29, 0.0 }
 0x15f   : > { %v576_v40 = vmax.f32 %v476_v32, 0.0  ;;  %v592_v41 = vmax.f32 %v540_v33, 0.0 }
 0x160   : > { %v991_v42 = vpack.c.bf16 %v578_v36, %v577_v34  ;;  %v1031_v43 = vpack.c.bf16 %v594_v37, %v593_v35 }
 0x161   : > { %v986_v44 = vpack.c.bf16 %v576_v40, %v575_v38  ;;  %v1026_v45 = vpack.c.bf16 %v592_v41, %v591_v39  ;;  %v1112_v46 = vpop.f32.mrb[12].mxu0  ;;  %v1128_v47 = vpop.f32.mrb[12].mxu1 }
 0x162   : > { %1047 = vst [vmem:[%s1580_s8 + $0x28] sm:$0xff] %v991_v42   ;;  %1055 = vst [vmem:[%s1580_s8 + $0x68] sm:$0xff] %v1031_v43   ;;  %v497_v48 = vadd.f32 %v1112_v46, %v1568_v24  ;;  %v561_v49 = vadd.f32 %v1128_v47, %v1568_v24  ;;  %v488_v50 = vpop.f32.mrb[13].mxu0  ;;  %v552_v51 = vpop.f32.mrb[13].mxu1 }
 0x163   : > { %1046 = vst [vmem:[%s1580_s8 + $0x20] sm:$0xff] %v986_v44   ;;  %1054 = vst [vmem:[%s1580_s8 + $0x60] sm:$0xff] %v1026_v45   ;;  %v489_v52 = vadd.f32 %v1568_v24, %v488_v50  ;;  %v553_v53 = vadd.f32 %v1568_v24, %v552_v51  ;;  %v1113_v54 = vpop.f32.mrb[14].mxu0  ;;  %v1129_v55 = vpop.f32.mrb[14].mxu1 }
 0x164   : > { %v500_v56 = vadd.f32 %v1113_v54, %v1568_v24  ;;  %v564_v57 = vadd.f32 %v1129_v55, %v1568_v24  ;;  %v491_v58 = vpop.f32.mrb[15].mxu0  ;;  %v555_v59 = vpop.f32.mrb[15].mxu1  ;;  %v581_v62 = vmax.f32 %v497_v48, 0.0  ;;  %v597_v63 = vmax.f32 %v561_v49, 0.0 }
 0x165   : > { %v492_v60 = vadd.f32 %v1568_v24, %v491_v58  ;;  %v556_v61 = vadd.f32 %v1568_v24, %v555_v59  ;;  %v579_v2 = vmax.f32 %v489_v52, 0.0  ;;  %v595_v3 = vmax.f32 %v553_v53, 0.0 }
 0x166   : > { %v582_v0 = vmax.f32 %v500_v56, 0.0  ;;  %v598_v1 = vmax.f32 %v564_v57, 0.0 }
 0x167   : > { %v580_v4 = vmax.f32 %v492_v60, 0.0  ;;  %v596_v5 = vmax.f32 %v556_v61, 0.0 }
 0x168   : > { %v1001_v6 = vpack.c.bf16 %v582_v0, %v581_v62  ;;  %v1041_v7 = vpack.c.bf16 %v598_v1, %v597_v63 }
 0x169   : > { %v996_v24 = vpack.c.bf16 %v580_v4, %v579_v2  ;;  %v1036_v8 = vpack.c.bf16 %v596_v5, %v595_v3 }
 0x16a   : > { %1049 = vst [vmem:[%s1580_s8 + $0x38] sm:$0xff] %v1001_v6   ;;  %1057 = vst [vmem:[%s1580_s8 + $0x78] sm:$0xff] %v1041_v7  }
 0x16b   : > { %1048 = vst [vmem:[%s1580_s8 + $0x30] sm:$0xff] %v996_v24   ;;  %1056 = vst [vmem:[%s1580_s8 + $0x70] sm:$0xff] %v1036_v8  }
 0x16c   : > { %1302 = shalt.err (!%p1299_p7)
}
 0x16d   : > { %s1303_s30 = scalar_lea.hbm %s1623_s16, 2048  ;;  %s1307_s10 = scalar_lea.hbm %s1676_s3, 4096 }
 0x16e   : > { %p1304_p9 = scmp.ne.s32.totalorder %s1623_s16, %s1303_s30  ;;  %p1308_p5 = scmp.lt.u32.totalorder %s1623_s16, %s1676_s3 }
 0x16f   : > { %p1309_p11 = scmp.lt.u32.totalorder %s1307_s10, %s1303_s30  ;;  %p1311_p4 = scmp.lt.u32.totalorder %s1303_s30, %s1623_s16 }
 0x170   : > { %p1305_p1 = pnand %p1304_p9, %p1482_p12 }
 0x171   : > { %p1310_p2 = por %p1309_p11, %p1308_p5 }
 0x172   : > { %p1306_p0 = pneg %p1305_p1 }
 0x173   : > { %p1312_p6 = por %p1311_p4, %p1310_p2 }
 0x175   : > { %p1313_p8 = pnand %p1312_p6, %p1306_p0 }
 0x177   : > { %1316 = shalt.err (!%p1313_p8)
}
 0x178   : > { %s1366_s20 = smov 64   ;;  %s1367_s8 = smov 4  }
 0x179   : > { %1152 = dma.vmem_to_hbm [thread:$0]  (%p1482_p12), %s1625_s4, 2048, %s1623_s16, %s760_s11, %s1366_s20, %s1366_s20, %s1367_s8  }
 0x17a PF: > { %s788_s9 = sand.u32 1, %s1347_s12   ;;  %p1691_p10 = scmp.ne.s32.totalorder %s1681_s19, 0 }
 0x17b   : > { %p1692_p13 = scmp.ge.s32.totalorder %s1359_s15, 2  ;;  %s789_s25 = scalar_lea.sflag [#allocation4], %s788_s9 }
 0x17d   : > { %p1163_p3 = pnand %p1692_p13, %p1691_p10 }
 0x17f   : > { %1342 = dma.done.wait (!%p1163_p3), %s789_s25, 2048  }
 0x180   : > { %1344 = vsyncadd (!%p1163_p3), %s789_s25, 4294965248  ;;  %p17_p7 = scmp.ge.s32.totalorder %s1444_s24, 4   ;;  %s1693_s12 = smov %s1351_s13 }
 0x181   : > { %s1694_s13 = smov %s1355_s14  ;;  %s1695_s14 = smov %s1478_s17 }
 0x182   : > { %s1696_s15 = smov %s1444_s24  ;;  %19 = sbr.rel (!%p17_p7) target bundleno = 6 (0x6), region = 81 }
 0x189   :  { %794 = vsyncpa [#allocation3], 1 }
 0x18a   :  { %796 = vsyncpa [#allocation3 + $0x1], 1 }
 0x18b   :  { %797 = vsyncpa [#allocation6], 1 }
 0x18c   :  { %798 = vsyncpa [#allocation4], 1 }
 0x18d   :  { %800 = vsyncpa [#allocation4 + $0x1], 1 }

</bundles_post_ra>
